<compile_context>
chip_gen: v5e
topology: v5e:2x2
jax: 0.10.0
libtpu: 0.0.40
codegen_flags: <defaults>
</compile_context>

<pallas_src>
import functools

import jax
import jax.numpy as jnp
from jax.experimental import pallas as pl
from jax.experimental.pallas import tpu as pltpu


def _tpu_hw():
    """Best-effort trace-time hardware query; conservative fallbacks."""
    vmem_cap = 64 * 1024 * 1024   # safe for every generation (v7x per-TC size)
    cores = 1
    try:
        info = pltpu.get_tpu_info()
        cap = getattr(info, "vmem_capacity_bytes", None)
        if cap:
            vmem_cap = int(cap)
        for name in ("num_cores", "core_count", "num_tensorcores"):
            v = getattr(info, name, None)
            if v:
                cores = int(v)
                break
    except Exception:
        pass
    try:
        kind = jax.devices()[0].device_kind.lower()
        if cores == 1 and "7x" in kind:
            cores = 2  # v7x: 2 TensorCores per chip
    except Exception:
        pass
    return vmem_cap, cores


def _js_loss_kernel(inp_ref, tgt_ref, out_ref, *, B, D, T,
                    need_row_mask, need_col_mask, vreg_acc):
    """One (TM, TD) tile of the fused JS pointwise loss; accumulate per partition."""
    c = pl.program_id(0)      # partition ("parallel", megacore on v7x)
    t_id = pl.program_id(1)   # row-tile reduction axis ("arbitrary")
    d_id = pl.program_id(2)   # lane-tile reduction axis ("arbitrary")

    @pl.when(jnp.logical_and(t_id == 0, d_id == 0))
    def _init():
        out_ref[...] = jnp.zeros_like(out_ref)

    # Stream in native dtype (bf16 callers pay half the HBM reads), upcast here.
    x = inp_ref[...].astype(jnp.float32)
    y = tgt_ref[...].astype(jnp.float32)
    TM, TD = x.shape

    net = (x + y) * 0.5
    pos = net > 0.0
    # Clamp the log argument so NaN/-inf never enter the dataflow.
    log_net = jnp.log(jnp.where(pos, net, 1.0))
    term = jnp.where(pos, net * (log_net - net), 0.0)

    # Mask ragged row / column tails (replaces wrapper-side jnp.pad copies).
    if need_row_mask or need_col_mask:
        valid = None
        if need_row_mask:
            tile = c * T + t_id   # un-clamped tile index -> clamped tiles masked out
            rows = tile * TM + jax.lax.broadcasted_iota(jnp.int32, (TM, TD), 0)
            valid = rows < B
        if need_col_mask:
            cols = d_id * TD + jax.lax.broadcasted_iota(jnp.int32, (TM, TD), 1)
            cmask = cols < D
            valid = cmask if valid is None else jnp.logical_and(valid, cmask)
        term = jnp.where(valid, term, 0.0)

    if vreg_acc:
        # Fold sublane groups then lane groups with aligned static slices:
        # layout-natural vector adds only (no per-step cross-lane reduce),
        # and a 1024-way partial-sum accumulator for better accuracy.
        part = term[0:8, :]
        for r in range(1, TM // 8):
            part = part + term[r * 8:(r + 1) * 8, :]
        acc = part[:, 0:128]
        for g in range(1, TD // 128):
            acc = acc + part[:, g * 128:(g + 1) * 128]
        out_ref[...] += acc
    else:
        # Small non-128-aligned D: scalar reduce, broadcast into the block.
        out_ref[...] += jnp.sum(term)


def js_loss(inp, tgt, *, row_tile=None, lane_tile=None, num_partitions=None):
    assert inp.shape == tgt.shape and inp.ndim == 2
    B, D = inp.shape
    vmem_cap, n_cores = _tpu_hw()

    # Partition count: one per TensorCore (v7x: 2), 1 elsewhere; overridable.
    P = n_cores if num_partitions is None else int(num_partitions)
    P = max(1, min(P, pl.cdiv(B, 8)))

    bytes_per_elem = inp.dtype.itemsize + tgt.dtype.itemsize
    # VMEM budget for the double-buffered input working set (generation aware).
    budget = min(vmem_cap // 3, 48 * 1024 * 1024)

    # Lane (feature) tile: full D when modest, else 128-aligned tiles so the
    # row tile never collapses for huge-vocab inputs.
    if lane_tile is not None:
        TD = int(lane_tile)
        assert TD == D or TD % 128 == 0, "lane_tile must be 128-aligned or == D"
    elif D % 128 == 0:
        TD = min(D, 8192)
    elif D <= 8192:
        TD = D                      # full-dim block (allowed for any D)
    else:
        TD = 8192                   # boundary D-tile masked in-kernel

    # Row tile: multiple of 8, sized so 2 inputs x 2 buffers fit the budget.
    elems_cap = max(8 * TD, budget // (2 * bytes_per_elem))
    tm_cap = max(8, min(4096, (elems_cap // TD) // 8 * 8))
    rows_per_part = pl.cdiv(B, P)
    TM = min(tm_cap, pl.cdiv(rows_per_part, 8) * 8)
    if row_tile is not None:
        TM = max(8, min(TM, (int(row_tile) // 8) * 8))

    n_row_tiles = pl.cdiv(B, TM)
    P = max(1, min(P, n_row_tiles))
    T = pl.cdiv(n_row_tiles, P)
    DT = pl.cdiv(D, TD)

    need_row_mask = (P * T * TM != B)
    need_col_mask = (DT * TD != D)
    vreg_acc = (TD % 128 == 0)

    # Row-block index, clamped so uneven partition splits never DMA out of range
    # (the un-clamped index in the kernel's row mask zeroes those tiles).
    if P * T == n_row_tiles:
        row_block = lambda c, t: c * T + t
    else:
        row_block = lambda c, t: jnp.minimum(c * T + t, n_row_tiles - 1)
    in_map = lambda c, t, d: (row_block(c, t), d)

    kernel = functools.partial(
        _js_loss_kernel, B=B, D=D, T=T,
        need_row_mask=need_row_mask, need_col_mask=need_col_mask,
        vreg_acc=vreg_acc)

    n_elem = B * D
    working_set = 2 * TM * TD * bytes_per_elem
    vmem_limit = int(min(vmem_cap, max(32 * 1024 * 1024,
                                       working_set + 16 * 1024 * 1024)))

    partials = pl.pallas_call(
        kernel,
        out_shape=jax.ShapeDtypeStruct((P * 8, 128), jnp.float32),
        grid_spec=pltpu.PrefetchScalarGridSpec(
            num_scalar_prefetch=0,
            grid=(P, T, DT),
            in_specs=[
                pl.BlockSpec((TM, TD), in_map),
                pl.BlockSpec((TM, TD), in_map),
            ],
            out_specs=pl.BlockSpec((8, 128), lambda c, t, d: (c, 0)),
        ),
        compiler_params=pltpu.CompilerParams(
            dimension_semantics=("parallel", "arbitrary", "arbitrary"),
            vmem_limit_bytes=vmem_limit,
        ),
        cost_estimate=pl.CostEstimate(
            flops=7 * n_elem,
            transcendentals=n_elem,
            bytes_accessed=n_elem * bytes_per_elem + P * 8 * 128 * 4,
        ),
    )(inp, tgt)

    # 'batchmean' scaling; the 0.5 * 2 factor already cancelled in the fusion.
    if vreg_acc:
        total = jnp.sum(partials)
    else:
        # Scalar-broadcast fallback: every element of a partition block holds
        # that partition's partial sum; pick one per partition.
        total = jnp.sum(partials[::8, 0])
    return total / jnp.float32(B)


def js_loss_ref(inp, tgt):
    """Pure-JAX reference: 0.5*(F.kl_div(input,net)+F.kl_div(target,net)), batchmean."""
    inp = inp.astype(jnp.float32)
    tgt = tgt.astype(jnp.float32)
    net = (inp + tgt) * 0.5
    log_net = jnp.log(jnp.where(net > 0, net, 1.0))
    t1 = jnp.where(net > 0, net * (log_net - inp), 0.0)
    t2 = jnp.where(net > 0, net * (log_net - tgt), 0.0)
    B = inp.shape[0]
    return 0.5 * (jnp.sum(t1) / B + jnp.sum(t2) / B)


if __name__ == "__main__":
    key = jax.random.PRNGKey(0)
    ks = jax.random.split(key, 8)

    # Case 1: aligned f32 shapes, single tile, vreg-accumulate path.
    B1, D1 = 8, 256
    inp1 = jax.nn.log_softmax(jax.random.normal(ks[0], (B1, D1), jnp.float32), axis=-1)
    tgt1 = jax.nn.softmax(jax.random.normal(ks[1], (B1, D1), jnp.float32), axis=-1)
    out1 = jax.block_until_ready(js_loss(inp1, tgt1))
    ref1 = jax.block_until_ready(js_loss_ref(inp1, tgt1))
    assert jnp.allclose(out1, ref1, rtol=1e-5, atol=1e-6), (out1, ref1)

    # Case 2: ragged rows + non-128 feature dim, forced 2 partitions and tiny
    # row tiles (exercises clamped tail tiles, row masking, scalar fallback).
    B2, D2 = 24, 40
    inp2 = jax.nn.log_softmax(jax.random.normal(ks[2], (B2, D2), jnp.float32), axis=-1)
    tgt2 = jax.nn.softmax(jax.random.normal(ks[3], (B2, D2), jnp.float32), axis=-1)
    out2 = jax.block_until_ready(js_loss(inp2, tgt2, row_tile=8, num_partitions=2))
    ref2 = jax.block_until_ready(js_loss_ref(inp2, tgt2))
    assert jnp.allclose(out2, ref2, rtol=1e-5, atol=1e-6), (out2, ref2)

    # Case 3: ragged rows AND ragged lane tiling (row + column masks, multiple
    # D-tiles accumulated on the vreg path).
    B3, D3 = 20, 200
    inp3 = jax.nn.log_softmax(jax.random.normal(ks[4], (B3, D3), jnp.float32), axis=-1)
    tgt3 = jax.nn.softmax(jax.random.normal(ks[5], (B3, D3), jnp.float32), axis=-1)
    out3 = jax.block_until_ready(js_loss(inp3, tgt3, row_tile=8, lane_tile=128))
    ref3 = jax.block_until_ready(js_loss_ref(inp3, tgt3))
    assert jnp.allclose(out3, ref3, rtol=1e-5, atol=1e-6), (out3, ref3)

    # Case 4: bf16 inputs streamed natively (in-kernel upcast, half the HBM reads).
    B4, D4 = 16, 128
    inp4 = jax.nn.log_softmax(jax.random.normal(ks[6], (B4, D4), jnp.float32), axis=-1).astype(jnp.bfloat16)
    tgt4 = jax.nn.softmax(jax.random.normal(ks[7], (B4, D4), jnp.float32), axis=-1).astype(jnp.bfloat16)
    out4 = jax.block_until_ready(js_loss(inp4, tgt4))
    ref4 = jax.block_until_ready(js_loss_ref(inp4, tgt4))
    assert jnp.allclose(out4, ref4, rtol=1e-4, atol=1e-5), (out4, ref4)

    print("KERNEL_OK")
</pallas_src>

<mosaic_0001>
module attributes {stable_mosaic.version = 11 : i64} {
  func.func @_js_loss_kernel(%arg0: i32, %arg1: i32, %arg2: i32, %arg3: memref<8x256xf32, #tpu.memory_space<vmem>>, %arg4: memref<8x256xf32, #tpu.memory_space<vmem>>, %arg5: memref<8x128xf32, #tpu.memory_space<vmem>>) attributes {dimension_semantics = [#tpu.dimension_semantics<parallel>, #tpu.dimension_semantics<arbitrary>, #tpu.dimension_semantics<arbitrary>], iteration_bounds = array<i64: 1, 1, 1>, scalar_prefetch = 0 : i64, scratch_operands = 0 : i64, tpu.core_type = #tpu.core_type<tc>, window_params = [{transform_indices = @transform_0, window_bounds = array<i64: 8, 256>}, {transform_indices = @transform_1, window_bounds = array<i64: 8, 256>}, {transform_indices = @transform_2, window_bounds = array<i64: 8, 128>}]} {
    %c0_i32 = arith.constant 0 : i32
    %0 = arith.cmpi eq, %arg1, %c0_i32 : i32
    %c0_i32_0 = arith.constant 0 : i32
    %1 = arith.cmpi eq, %arg2, %c0_i32_0 : i32
    %2 = arith.andi %0, %1 : i1
    %3 = arith.extui %2 : i1 to i32
    %c0_i32_1 = arith.constant 0 : i32
    %4 = arith.cmpi ne, %3, %c0_i32_1 : i32
    scf.if %4 {
      %cst_12 = arith.constant 0.000000e+00 : f32
      %25 = vector.broadcast %cst_12 : f32 to vector<8x128xf32>
      %c0_13 = arith.constant 0 : index
      %c0_14 = arith.constant 0 : index
      %26 = vector.load %arg5[%c0_13, %c0_14] : memref<8x128xf32, #tpu.memory_space<vmem>>, vector<8x128xf32>
      tpu.vector_store %arg5[%c0_13, %c0_14], %25 {strides = array<i32>} : memref<8x128xf32, #tpu.memory_space<vmem>>, vector<8x128xf32>,
    } else {
    }
    %c0 = arith.constant 0 : index
    %c0_2 = arith.constant 0 : index
    %5 = vector.load %arg3[%c0, %c0_2] : memref<8x256xf32, #tpu.memory_space<vmem>>, vector<8x256xf32>
    %c0_3 = arith.constant 0 : index
    %c0_4 = arith.constant 0 : index
    %6 = vector.load %arg4[%c0_3, %c0_4] : memref<8x256xf32, #tpu.memory_space<vmem>>, vector<8x256xf32>
    %7 = arith.addf %5, %6 : vector<8x256xf32>
    %cst = arith.constant 5.000000e-01 : f32
    %8 = vector.broadcast %cst : f32 to vector<8x256xf32>
    %9 = arith.mulf %7, %8 : vector<8x256xf32>
    %cst_5 = arith.constant 0.000000e+00 : f32
    %10 = vector.broadcast %cst_5 : f32 to vector<8x256xf32>
    %11 = arith.cmpf ogt, %9, %10 : vector<8x256xf32>
    %cst_6 = arith.constant 1.000000e+00 : f32
    %12 = vector.broadcast %cst_6 : f32 to vector<8x256xf32>
    %13 = arith.select %11, %9, %12 : vector<8x256xi1>, vector<8x256xf32>
    %14 = math.log %13 : vector<8x256xf32>
    %15 = arith.subf %14, %9 : vector<8x256xf32>
    %16 = arith.mulf %9, %15 : vector<8x256xf32>
    %cst_7 = arith.constant 0.000000e+00 : f32
    %17 = vector.broadcast %cst_7 : f32 to vector<8x256xf32>
    %18 = arith.select %11, %16, %17 : vector<8x256xi1>, vector<8x256xf32>
    %19 = vector.extract_strided_slice %18 {offsets = [0, 0], sizes = [8, 128], strides = [1, 1]} : vector<8x256xf32> to vector<8x128xf32>
    %20 = vector.extract_strided_slice %18 {offsets = [0, 128], sizes = [8, 128], strides = [1, 1]} : vector<8x256xf32> to vector<8x128xf32>
    %21 = arith.addf %19, %20 : vector<8x128xf32>
    %c0_8 = arith.constant 0 : index
    %c0_9 = arith.constant 0 : index
    %22 = vector.load %arg5[%c0_8, %c0_9] : memref<8x128xf32, #tpu.memory_space<vmem>>, vector<8x128xf32>
    %23 = arith.addf %22, %21 : vector<8x128xf32>
    %c0_10 = arith.constant 0 : index
    %c0_11 = arith.constant 0 : index
    %24 = vector.load %arg5[%c0_10, %c0_11] : memref<8x128xf32, #tpu.memory_space<vmem>>, vector<8x128xf32>
    tpu.vector_store %arg5[%c0_10, %c0_11], %23 {strides = array<i32>} : memref<8x128xf32, #tpu.memory_space<vmem>>, vector<8x128xf32>,
    return
  }
  func.func @transform_0(%arg0: i32, %arg1: i32, %arg2: i32) -> (i32, i32) {
    %c1_i32 = arith.constant 1 : i32
    %0 = arith.muli %arg0, %c1_i32 : i32
    %1 = arith.addi %0, %arg1 : i32
    %c0_i32 = arith.constant 0 : i32
    return %1, %arg2 : i32, i32
  }
  func.func @transform_1(%arg0: i32, %arg1: i32, %arg2: i32) -> (i32, i32) {
    %c1_i32 = arith.constant 1 : i32
    %0 = arith.muli %arg0, %c1_i32 : i32
    %1 = arith.addi %0, %arg1 : i32
    %c0_i32 = arith.constant 0 : i32
    return %1, %arg2 : i32, i32
  }
  func.func @transform_2(%arg0: i32, %arg1: i32, %arg2: i32) -> (i32, i32) {
    %c0_i32 = arith.constant 0 : i32
    %c0_i32_0 = arith.constant 0 : i32
    return %arg0, %c0_i32 : i32, i32
  }
}

</mosaic_0001>

<bundles_post_ra>
// kernel: tpu_custom_call.1
= control target key start
LH: loop header
LB: loop body
LE: loop exit
PB: predicated region body
PF: predicated region fallthrough
CT: control target
= control target key end

     0   :  { %7 = vsyncpa [#allocation3], 0  ;;  %s214_s0 = inlined_call_operand.hbm [shape: f32[8,256], index: 0, kind: input, shape index: {}]   ;;  %s215_s1 = inlined_call_operand.hbm [shape: f32[8,256], index: 1, kind: input, shape index: {}]   ;;  %s216_s2 = inlined_call_operand.hbm [shape: f32[8,128], index: 2, kind: output, shape index: {}]  }
   0x1   :  { %8 = vsyncpa [#allocation6], 0 }
   0x2   :  { %9 = vsyncpa [#allocation4], 0  ;;  %s19_s11 = sshll.u32 %s214_s0, 4  ;;  %s187_s12 = smov [#allocation2]   ;;  %s20_s11 = int_to_ptr.hbm [resolvable:$true] %s19_s11 }
   0x3   :  { %s21_s13 = sshll.u32 %s187_s12, 4  ;;  %s34_s16 = sshll.u32 %s215_s1, 4  ;;  %s22_s13 = int_to_ptr.vmem [resolvable:$true] %s21_s13  ;;  %s35_s16 = int_to_ptr.hbm [resolvable:$true] %s34_s16 }
   0x4   :  { %24 = dma.hbm_to_vmem [thread:$0]  %s20_s11, 256, %s22_s13, [#allocation3]  }
   0x5   :  { %s188_s17 = smov [#allocation5]  }
   0x6   :  { %s36_s18 = sshll.u32 %s188_s17, 4  ;;  %s37_s18 = int_to_ptr.vmem [resolvable:$true] %s36_s18 }
   0x7   :  { %39 = dma.hbm_to_vmem [thread:$0]  %s35_s16, 256, %s37_s18, [#allocation6]  }
   0x8   :  { %181 = dma.done.wait [#allocation3], 256  }
   0x9   :  { %182 = vsyncadd [#allocation3], 4294967040 }
   0xa   :  { %183 = dma.done.wait [#allocation6], 256  }
   0xb   :  { %184 = vsyncadd [#allocation6], 4294967040  ;;  %v57_v0 = vld [vmem:[#allocation2] sm:$0xff]  ;;  %v58_v1 = vld [vmem:[#allocation2 + $0x8] sm:$0xff]  ;;  %s189_s0 = smov [#allocation7]   ;;  %s90_s21 = sshll.u32 %s216_s2, 4  ;;  %s91_s21 = int_to_ptr.hbm [resolvable:$true] %s90_s21 }
   0xc   :  { %v59_v2 = vld [vmem:[#allocation5] sm:$0xff]  ;;  %v60_v3 = vld [vmem:[#allocation5 + $0x8] sm:$0xff]  ;;  %s88_s1 = sshll.u32 %s189_s0, 4  ;;  %s89_s1 = int_to_ptr.vmem [resolvable:$true] %s88_s1 }
   0xd   :  { %v61_v4 = vadd.f32 %v59_v2, %v57_v0  ;;  %v62_v5 = vadd.f32 %v60_v3, %v58_v1 }
   0xf   :  { %v63_v6 = vmul.f32 0.5, %v61_v4  ;;  %v64_v7 = vmul.f32 0.5, %v62_v5 }
  0x11   :  { %vm65_vm0 = vcmp.gt.f32.partialorder %v63_v6, 0.0  ;;  %vm66_vm1 = vcmp.gt.f32.partialorder %v64_v7, 0.0 }
  0x12   :  { %v67_v8 = vsel %vm65_vm0, %v63_v6, 1.0  ;;  %v68_v9 = vsel %vm66_vm1, %v64_v7, 1.0 }
  0x13   :  { %105 = vlog2.f32 %v67_v8 }
  0x14   :  { %107 = vlog2.f32 %v68_v9 }
  0x19   :  { %v106_v10 = vpop.eup %105 }
  0x1a   :  { %v108_v11 = vpop.eup %107  ;;  %v70_v12 = vmul.f32 0.6931472, %v106_v10 }
  0x1b   :  { %v72_v13 = vmul.f32 0.6931472, %v108_v11 }
  0x1c   :  { %v73_v14 = vsub.f32 %v70_v12, %v63_v6 }
  0x1d   :  { %v74_v15 = vsub.f32 %v72_v13, %v64_v7 }
  0x1e   :  { %v75_v16 = vmul.f32 %v73_v14, %v63_v6 }
  0x1f   :  { %v76_v17 = vmul.f32 %v74_v15, %v64_v7 }
  0x20   :  { %v77_v18 = vsel %vm65_vm0, %v75_v16, 0.0 }
  0x21   :  { %v78_v19 = vsel %vm66_vm1, %v76_v17, 0.0 }
  0x22   :  { %v79_v20 = vadd.f32 %v78_v19, %v77_v18 }
  0x24   :  { %82 = vst [vmem:[#allocation7] sm:$0xff] %v79_v20 }
  0x25   :  { %93 = dma.vmem_to_hbm [thread:$0]  %s89_s1, 128, %s91_s21, [#allocation4]  }
  0x26   :  { %185 = dma.done.wait [#allocation4], 128  }
  0x27   :  { %186 = vsyncadd [#allocation4], 4294967168 }
  0x28   :  { %98 = vsyncpa [#allocation3], 1 }
  0x29   :  { %99 = vsyncpa [#allocation6], 1 }
  0x2a   :  { %100 = vsyncpa [#allocation4], 1 }

</bundles_post_ra>
